<compile_context>
chip_gen: v5e
topology: v5e:2x2
jax: 0.10.0
libtpu: 0.0.40
codegen_flags: <defaults>
</compile_context>

<pallas_src>
import jax
import jax.numpy as jnp
import numpy as np
from jax.experimental import pallas as pl
from jax.experimental.pallas import tpu as pltpu


# ----------------------------- Pallas kernel -------------------------------

def _down_conv_kernel(p_ref, w_ref, b_ref, o_ref):
    # p_ref: (K, N*S)     bf16 im2col patches (K on sublanes, N*S on lanes)
    # w_ref: (Cout, K)    bf16
    # b_ref: (Cout, 1)    f32
    # o_ref: (Cout, N*S)  f32  -- lane-dense (N*S is a multiple of 128)
    acc = jnp.dot(w_ref[...], p_ref[...], preferred_element_type=jnp.float32)
    o_ref[...] = (acc + b_ref[...]).astype(o_ref.dtype)


# ------------------------------ Down forward --------------------------------

def down_forward(params, x):
    """Conv3d(in_ch, n_class, kernel_size=3, stride=(1,2,2), padding=1), NCDHW."""
    w = params["w"]                      # (Cout, Cin, 3, 3, 3) -- PyTorch layout
    b = params["b"]                      # (Cout,)
    N, Cin, D, H, W = x.shape
    Cout = w.shape[0]
    Do = D                               # depth: stride 1, pad 1, k 3
    Ho = (H + 1) // 2                    # H, W: stride 2, pad 1, k 3
    Wo = (W + 1) // 2
    S = Do * Ho * Wo                     # 512 at the test size
    NS = N * S                           # 1024 lanes (multiple of 128)

    # bf16 BEFORE the im2col, channel-major so rows = (cin, tap), cols = (n, s)
    # and the expanded patches array never needs a transpose or a pad pass.
    xt = jnp.transpose(x.astype(jnp.bfloat16), (1, 0, 2, 3, 4))   # (Cin, N, D, H, W)
    xp = jnp.pad(xt, ((0, 0), (0, 0), (1, 1), (1, 1), (1, 1)))

    taps = []
    for kd in range(3):
        for kh in range(3):
            for kw in range(3):
                taps.append(
                    xp[:, :,
                       kd:kd + Do,
                       kh:kh + 2 * Ho - 1:2,
                       kw:kw + 2 * Wo - 1:2])                      # (Cin, N, Do, Ho, Wo)
    # One zero tap pads K from 27*Cin to 28*Cin (multiple of 16 for bf16
    # sublane packing) inside the same stack -- no extra full-array jnp.pad.
    taps.append(jnp.zeros_like(taps[0]))
    n_taps = len(taps)                   # 28
    K = n_taps * Cin                     # 112

    patches = jnp.stack(taps, axis=1).reshape(K, NS)               # (K, N*S) bf16

    # Weight rows match (cin, tap) ordering: (Cout, Cin, 27) -> pad tap dim -> flat.
    w_mat = jnp.pad(w.reshape(Cout, Cin, 27), ((0, 0), (0, 0), (0, 1)))
    w_mat = w_mat.reshape(Cout, K).astype(jnp.bfloat16)
    b_col = b.reshape(Cout, 1).astype(jnp.float32)

    out = pl.pallas_call(
        _down_conv_kernel,
        out_shape=jax.ShapeDtypeStruct((Cout, NS), jnp.float32),
        in_specs=[
            pl.BlockSpec((K, NS), lambda: (0, 0)),
            pl.BlockSpec((Cout, K), lambda: (0, 0)),
            pl.BlockSpec((Cout, 1), lambda: (0, 0)),
        ],
        out_specs=pl.BlockSpec((Cout, NS), lambda: (0, 0)),
    )(patches, w_mat, b_col)

    # (Cout, N*S) -> (Cout, N, Do, Ho, Wo) -> NCDHW: only a ~32 KiB transpose.
    return jnp.transpose(out.reshape(Cout, N, Do, Ho, Wo), (1, 0, 2, 3, 4))


# ------------------------- pure-JAX reference ------------------------------

def down_forward_ref(params, x):
    y = jax.lax.conv_general_dilated(
        x, params["w"], window_strides=(1, 2, 2),
        padding=((1, 1), (1, 1), (1, 1)),
        dimension_numbers=("NCDHW", "OIDHW", "NCDHW"))
    return y + params["b"][None, :, None, None, None]


# --------------------------------- main -------------------------------------

if __name__ == "__main__":
    key = jax.random.PRNGKey(0)
    in_ch, n_class = 4, 8
    N, D, H, W = 2, 8, 16, 16
    kw_, kb_, kx_ = jax.random.split(key, 3)
    params = {
        "w": 0.1 * jax.random.normal(kw_, (n_class, in_ch, 3, 3, 3), jnp.float32),
        "b": 0.1 * jax.random.normal(kb_, (n_class,), jnp.float32),
    }
    x = jax.random.normal(kx_, (N, in_ch, D, H, W), jnp.float32)

    down = jax.jit(down_forward)
    out = jax.block_until_ready(down(params, x))
    ref = jax.block_until_ready(down_forward_ref(params, x))

    assert out.shape == (N, n_class, D, H // 2, W // 2), out.shape
    # bf16 MXU inputs with f32 accumulation -> compare against the f32 reference
    # at a tolerance that bf16 quantization comfortably meets.
    np.testing.assert_allclose(np.asarray(out), np.asarray(ref), rtol=2e-2, atol=2e-2)
    print("KERNEL_OK")
</pallas_src>

<mosaic_0001>
module attributes {stable_mosaic.version = 11 : i64} {
  func.func @_down_conv_kernel(%arg0: memref<112x1024xbf16, #tpu.memory_space<vmem>>, %arg1: memref<8x112xbf16, #tpu.memory_space<vmem>>, %arg2: memref<8x1xf32, #tpu.memory_space<vmem>>, %arg3: memref<8x1024xf32, #tpu.memory_space<vmem>>) attributes {dimension_semantics = [], scalar_prefetch = 0 : i64, scratch_operands = 0 : i64, tpu.core_type = #tpu.core_type<tc>} {
    %c0 = arith.constant 0 : index
    %c0_0 = arith.constant 0 : index
    %0 = vector.load %arg1[%c0, %c0_0] : memref<8x112xbf16, #tpu.memory_space<vmem>>, vector<8x112xbf16>
    %c0_1 = arith.constant 0 : index
    %c0_2 = arith.constant 0 : index
    %1 = vector.load %arg0[%c0_1, %c0_2] : memref<112x1024xbf16, #tpu.memory_space<vmem>>, vector<112x1024xbf16>
    %cst = arith.constant dense<0.000000e+00> : vector<8x1024xf32>
    %2 = tpu.matmul %0, %1, %cst {dimension_numbers = #tpu.dot_dimension_numbers<[1], [0], [0], [1], [0, 0, 1, 1], [], []>} : vector<8x112xbf16>, vector<112x1024xbf16>, vector<8x1024xf32> -> vector<8x1024xf32>
    %c0_3 = arith.constant 0 : index
    %c0_4 = arith.constant 0 : index
    %3 = vector.load %arg2[%c0_3, %c0_4] : memref<8x1xf32, #tpu.memory_space<vmem>>, vector<8x1xf32>
    %4 = vector.broadcast %3 : vector<8x1xf32> to vector<8x1024xf32>
    %5 = arith.addf %2, %4 : vector<8x1024xf32>
    %c0_5 = arith.constant 0 : index
    %c0_6 = arith.constant 0 : index
    %6 = vector.load %arg3[%c0_5, %c0_6] : memref<8x1024xf32, #tpu.memory_space<vmem>>, vector<8x1024xf32>
    tpu.vector_store %arg3[%c0_5, %c0_6], %5 {strides = array<i32>} : memref<8x1024xf32, #tpu.memory_space<vmem>>, vector<8x1024xf32>,
    return
  }
}

</mosaic_0001>

<bundles_post_ra>
// kernel: down_forward.1
= control target key start
LH: loop header
LB: loop body
LE: loop exit
PB: predicated region body
PF: predicated region fallthrough
CT: control target
= control target key end

     0   :  { %vm358_vm0 = vcmask 916480   ;;  %s1173_s0 = inlined_call_operand.vmem [shape: bf16[112,1024], index: 0, kind: input, shape index: {}]   ;;  %s1174_s1 = inlined_call_operand.vmem [shape: bf16[8,112], index: 1, kind: input, shape index: {}]   ;;  %s1175_s2 = inlined_call_operand.vmem [shape: f32[8,1], index: 2, kind: input, shape index: {}]   ;;  %s1176_s3 = inlined_call_operand.vmem [shape: f32[8,1024], index: 3, kind: output, shape index: {}]  }
   0x1   :  { %v672_v0 = vld [vmem:[%s1173_s0 + $0x180] sm:$0xf]  ;;  %v758_v2 = vld [vmem:[%s1173_s0 + $0x184] sm:$0xf]  ;;  %v680_v5 = vld [vmem:[%s1173_s0 + $0x188] sm:$0xf] }
   0x2   :  { %v762_v1 = vld [vmem:[%s1173_s0 + $0x19c] sm:$0xf0]  ;;  %v674_v4 = vld [vmem:[%s1173_s0 + $0x1a0] sm:$0xf0]  ;;  %v763_v6 = vld [vmem:[%s1173_s0 + $0x1a4] sm:$0xf0] }
   0x3   :  { %v673_v3 = vor.u32 %v762_v1, %v672_v0  ;;  %v677_v7 = vor.u32 %v758_v2, %v674_v4  ;;  %v681_v8 = vor.u32 %v763_v6, %v680_v5  ;;  %v759_v9 = vld [vmem:[%s1173_s0 + $0x18c] sm:$0xf]  ;;  %v640_v11 = vld [vmem:[%s1173_s0 + $0x140] sm:$0xf]  ;;  %v750_v14 = vld [vmem:[%s1173_s0 + $0x144] sm:$0xf] }
   0x4   :  { %v682_v10 = vld [vmem:[%s1173_s0 + $0x1a8] sm:$0xf0]  ;;  %v754_v13 = vld [vmem:[%s1173_s0 + $0x15c] sm:$0xf0]  ;;  %v642_v15 = vld [vmem:[%s1173_s0 + $0x160] sm:$0xf0] }
   0x5   :  { %363 = vmatpush.bf16.msra.mxu0 %v673_v3  ;;  %v685_v12 = vor.u32 %v759_v9, %v682_v10  ;;  %376 = vmatpush.bf16.msra.mxu1 %v677_v7  ;;  %v641_v16 = vor.u32 %v754_v13, %v640_v11  ;;  %v645_v17 = vor.u32 %v750_v14, %v642_v15  ;;  %v648_v18 = vld [vmem:[%s1173_s0 + $0x148] sm:$0xf]  ;;  %v751_v20 = vld [vmem:[%s1173_s0 + $0x14c] sm:$0xf]  ;;  %v608_v23 = vld [vmem:[%s1173_s0 + $0x100] sm:$0xf] }
   0x6   :  { %389 = vmatpush.bf16.msra.mxu2 %v681_v8  ;;  %v755_v19 = vld [vmem:[%s1173_s0 + $0x164] sm:$0xf0]  ;;  %v650_v22 = vld [vmem:[%s1173_s0 + $0x168] sm:$0xf0]  ;;  %v746_v24 = vld [vmem:[%s1173_s0 + $0x11c] sm:$0xf0] }
   0x7   :  { %402 = vmatpush.bf16.msra.mxu3 %v685_v12  ;;  %v649_v21 = vor.u32 %v755_v19, %v648_v18  ;;  %v653_v25 = vor.u32 %v751_v20, %v650_v22  ;;  %v742_v26 = vld [vmem:[%s1173_s0 + $0x104] sm:$0xf]  ;;  %v616_v28 = vld [vmem:[%s1173_s0 + $0x108] sm:$0xf]  ;;  %v609_v29 = vor.u32 %v746_v24, %v608_v23  ;;  %v743_v31 = vld [vmem:[%s1173_s0 + $0x10c] sm:$0xf] }
   0x8   :  { %v610_v27 = vld [vmem:[%s1173_s0 + $0x120] sm:$0xf0]  ;;  %v747_v30 = vld [vmem:[%s1173_s0 + $0x124] sm:$0xf0]  ;;  %v618_v32 = vld [vmem:[%s1173_s0 + $0x128] sm:$0xf0] }
   0x9   :  { %364 = vmatpush.bf16.msra.mxu0 %v641_v16  ;;  %377 = vmatpush.bf16.msra.mxu1 %v645_v17  ;;  %v613_v33 = vor.u32 %v742_v26, %v610_v27  ;;  %v617_v34 = vor.u32 %v747_v30, %v616_v28  ;;  %v576_v35 = vld [vmem:[%s1173_s0 + $0xc0] sm:$0xf]  ;;  %v734_v37 = vld [vmem:[%s1173_s0 + $0xc4] sm:$0xf]  ;;  %v621_v38 = vor.u32 %v743_v31, %v618_v32  ;;  %v584_v40 = vld [vmem:[%s1173_s0 + $0xc8] sm:$0xf] }
   0xa   :  { %390 = vmatpush.bf16.msra.mxu2 %v649_v21  ;;  %v738_v36 = vld [vmem:[%s1173_s0 + $0xdc] sm:$0xf0]  ;;  %v578_v39 = vld [vmem:[%s1173_s0 + $0xe0] sm:$0xf0]  ;;  %v739_v41 = vld [vmem:[%s1173_s0 + $0xe4] sm:$0xf0] }
   0xb   :  { %403 = vmatpush.bf16.msra.mxu3 %v653_v25  ;;  %v735_v42 = vld [vmem:[%s1173_s0 + $0xcc] sm:$0xf]  ;;  %v577_v44 = vor.u32 %v738_v36, %v576_v35  ;;  %v581_v45 = vor.u32 %v734_v37, %v578_v39  ;;  %v585_v46 = vor.u32 %v739_v41, %v584_v40  ;;  %v544_v47 = vld [vmem:[%s1173_s0 + $0x80] sm:$0xf]  ;;  %v726_v49 = vld [vmem:[%s1173_s0 + $0x84] sm:$0xf] }
   0xc   :  { %v586_v43 = vld [vmem:[%s1173_s0 + $0xe8] sm:$0xf0]  ;;  %v730_v48 = vld [vmem:[%s1173_s0 + $0x9c] sm:$0xf0]  ;;  %v546_v51 = vld [vmem:[%s1173_s0 + $0xa0] sm:$0xf0] }
   0xd   :  { %365 = vmatpush.bf16.msra.mxu0 %v609_v29  ;;  %378 = vmatpush.bf16.msra.mxu1 %v613_v33  ;;  %v589_v50 = vor.u32 %v735_v42, %v586_v43  ;;  %v552_v52 = vld [vmem:[%s1173_s0 + $0x88] sm:$0xf]  ;;  %v727_v54 = vld [vmem:[%s1173_s0 + $0x8c] sm:$0xf]  ;;  %v545_v56 = vor.u32 %v730_v48, %v544_v47  ;;  %v549_v57 = vor.u32 %v726_v49, %v546_v51  ;;  %v512_v59 = vld [vmem:[%s1173_s0 + $0x40] sm:$0xf] }
   0xe   :  { %391 = vmatpush.bf16.msra.mxu2 %v617_v34  ;;  %v731_v53 = vld [vmem:[%s1173_s0 + $0xa4] sm:$0xf0]  ;;  %v554_v55 = vld [vmem:[%s1173_s0 + $0xa8] sm:$0xf0]  ;;  %v722_v60 = vld [vmem:[%s1173_s0 + $0x5c] sm:$0xf0] }
   0xf   :  { %404 = vmatpush.bf16.msra.mxu3 %v621_v38  ;;  %v553_v58 = vor.u32 %v731_v53, %v552_v52  ;;  %v718_v61 = vld [vmem:[%s1173_s0 + $0x44] sm:$0xf]  ;;  %v557_v62 = vor.u32 %v727_v54, %v554_v55  ;;  %v520_v0 = vld [vmem:[%s1173_s0 + $0x48] sm:$0xf]  ;;  %v719_v2 = vld [vmem:[%s1173_s0 + $0x4c] sm:$0xf]  ;;  %v513_v4 = vor.u32 %v722_v60, %v512_v59 }
  0x10   :  { %v514_v63 = vld [vmem:[%s1173_s0 + $0x60] sm:$0xf0]  ;;  %v723_v1 = vld [vmem:[%s1173_s0 + $0x64] sm:$0xf0]  ;;  %v522_v3 = vld [vmem:[%s1173_s0 + $0x68] sm:$0xf0] }
  0x11   :  { %366 = vmatpush.bf16.msra.mxu0 %v577_v44  ;;  %379 = vmatpush.bf16.msra.mxu1 %v581_v45  ;;  %v480_v5 = vld [vmem:[%s1173_s0] sm:$0xf]  ;;  %v517_v7 = vor.u32 %v718_v61, %v514_v63  ;;  %v521_v8 = vor.u32 %v723_v1, %v520_v0  ;;  %v710_v9 = vld [vmem:[%s1173_s0 + $0x4] sm:$0xf]  ;;  %v488_v11 = vld [vmem:[%s1173_s0 + $0x8] sm:$0xf]  ;;  %v525_v12 = vor.u32 %v719_v2, %v522_v3 }
  0x12   :  { %392 = vmatpush.bf16.msra.mxu2 %v585_v46  ;;  %v714_v6 = vld [vmem:[%s1173_s0 + $0x1c] sm:$0xf0]  ;;  %v482_v10 = vld [vmem:[%s1173_s0 + $0x20] sm:$0xf0]  ;;  %v715_v13 = vld [vmem:[%s1173_s0 + $0x24] sm:$0xf0] }
  0x13   :  { %405 = vmatpush.bf16.msra.mxu3 %v589_v50  ;;  %v711_v14 = vld [vmem:[%s1173_s0 + $0xc] sm:$0xf]  ;;  %v688_v16 = vld [vmem:[%s1173_s0 + $0x190] sm:$0xf]  ;;  %v760_v18 = vld [vmem:[%s1173_s0 + $0x194] sm:$0xf]  ;;  %v481_v19 = vor.u32 %v714_v6, %v480_v5  ;;  %v485_v23 = vor.u32 %v710_v9, %v482_v10  ;;  %v489_v24 = vor.u32 %v715_v13, %v488_v11 }
  0x14   :  { %v490_v15 = vld [vmem:[%s1173_s0 + $0x28] sm:$0xf0]  ;;  %v764_v17 = vld [vmem:[%s1173_s0 + $0x1ac] sm:$0xf0]  ;;  %v690_v20 = vld [vmem:[%s1173_s0 + $0x1b0] sm:$0xf0] }
  0x15   :  { %367 = vmatpush.bf16.msra.mxu0 %v545_v56  ;;  %380 = vmatpush.bf16.msra.mxu1 %v549_v57  ;;  %v696_v21 = vld [vmem:[%s1173_s0 + $0x198] sm:$0xf]  ;;  %v761_v25 = vld [vmem:[%s1173_s0 + $0x19c] sm:$0xf]  ;;  %v493_v27 = vor.u32 %v711_v14, %v490_v15  ;;  %v689_v28 = vor.u32 %v764_v17, %v688_v16  ;;  %v693_v29 = vor.u32 %v760_v18, %v690_v20  ;;  %v656_v31 = vld [vmem:[%s1173_s0 + $0x150] sm:$0xf] }
  0x16   :  { %393 = vmatpush.bf16.msra.mxu2 %v553_v58  ;;  %v765_v22 = vld [vmem:[%s1173_s0 + $0x1b4] sm:$0xf0]  ;;  %v698_v26 = vld [vmem:[%s1173_s0 + $0x1b8] sm:$0xf0]  ;;  %v756_v32 = vld [vmem:[%s1173_s0 + $0x16c] sm:$0xf0] }
  0x17   :  { %406 = vmatpush.bf16.msra.mxu3 %v557_v62  ;;  %v697_v30 = vor.u32 %v765_v22, %v696_v21  ;;  %v752_v33 = vld [vmem:[%s1173_s0 + $0x154] sm:$0xf]  ;;  %v701_v34 = vor.u32 %v761_v25, %v698_v26  ;;  %v664_v36 = vld [vmem:[%s1173_s0 + $0x158] sm:$0xf]  ;;  %v1002_v38 = vld [vmem:[%s1174_s1] sm:$0xf]  ;;  %v657_v41 = vor.u32 %v756_v32, %v656_v31 }
  0x18   :  { %v658_v35 = vld [vmem:[%s1173_s0 + $0x170] sm:$0xf0]  ;;  %v757_v37 = vld [vmem:[%s1173_s0 + $0x174] sm:$0xf0]  ;;  %v753_v39 = vld [vmem:[%s1173_s0 + $0x15c] sm:$0xf] }
  0x19   :  { %368 = vmatpush.bf16.msra.mxu0 %v513_v4  ;;  %381 = vmatpush.bf16.msra.mxu1 %v517_v7  ;;  %v666_v40 = vld [vmem:[%s1173_s0 + $0x178] sm:$0xf0]  ;;  %v661_v42 = vor.u32 %v752_v33, %v658_v35  ;;  %v665_v43 = vor.u32 %v757_v37, %v664_v36  ;;  %v624_v44 = vld [vmem:[%s1173_s0 + $0x110] sm:$0xf]  ;;  %v744_v46 = vld [vmem:[%s1173_s0 + $0x114] sm:$0xf] }
  0x1a   :  { %394 = vmatpush.bf16.msra.mxu2 %v521_v8  ;;  %v748_v45 = vld [vmem:[%s1173_s0 + $0x12c] sm:$0xf0]  ;;  %v669_v47 = vor.u32 %v753_v39, %v666_v40  ;;  %v626_v48 = vld [vmem:[%s1173_s0 + $0x130] sm:$0xf0]  ;;  %v632_v49 = vld [vmem:[%s1173_s0 + $0x118] sm:$0xf] }
  0x1b   :  { %407 = vmatpush.bf16.msra.mxu3 %v525_v12  ;;  %v749_v50 = vld [vmem:[%s1173_s0 + $0x134] sm:$0xf0]  ;;  %v745_v51 = vld [vmem:[%s1173_s0 + $0x11c] sm:$0xf]  ;;  %v625_v53 = vor.u32 %v748_v45, %v624_v44  ;;  %v629_v54 = vor.u32 %v744_v46, %v626_v48  ;;  %v592_v56 = vld [vmem:[%s1173_s0 + $0xd0] sm:$0xf] }
  0x1c   :  { %v634_v52 = vld [vmem:[%s1173_s0 + $0x138] sm:$0xf0]  ;;  %v633_v55 = vor.u32 %v749_v50, %v632_v49  ;;  %v740_v57 = vld [vmem:[%s1173_s0 + $0xec] sm:$0xf0]  ;;  %v736_v58 = vld [vmem:[%s1173_s0 + $0xd4] sm:$0xf] }
  0x1d   :  { %369 = vmatpush.bf16.msra.mxu0 %v481_v19  ;;  %382 = vmatpush.bf16.msra.mxu1 %v485_v23  ;;  %v637_v59 = vor.u32 %v745_v51, %v634_v52  ;;  %v594_v60 = vld [vmem:[%s1173_s0 + $0xf0] sm:$0xf0]  ;;  %v600_v61 = vld [vmem:[%s1173_s0 + $0xd8] sm:$0xf]  ;;  %v737_v63 = vld [vmem:[%s1173_s0 + $0xdc] sm:$0xf]  ;;  %v593_v1 = vor.u32 %v740_v57, %v592_v56 }
  0x1e   :  { %395 = vmatpush.bf16.msra.mxu2 %v489_v24  ;;  %v741_v62 = vld [vmem:[%s1173_s0 + $0xf4] sm:$0xf0]  ;;  %v602_v0 = vld [vmem:[%s1173_s0 + $0xf8] sm:$0xf0]  ;;  %v72_v2 = vld [vmem:[%s1175_s2] sm:$0xff]  ;;  %v597_v3 = vor.u32 %v736_v58, %v594_v60  ;;  %v768_v12 = vmov 0  }
  0x1f   :  { %408 = vmatpush.bf16.msra.mxu3 %v493_v27  ;;  %v601_v4 = vor.u32 %v741_v62, %v600_v61  ;;  %v560_v5 = vld [vmem:[%s1173_s0 + $0x90] sm:$0xf]  ;;  %v728_v7 = vld [vmem:[%s1173_s0 + $0x94] sm:$0xf]  ;;  %v605_v8 = vor.u32 %v737_v63, %v602_v0  ;;  %v568_v10 = vld [vmem:[%s1173_s0 + $0x98] sm:$0xf]  ;;  %767 = vset.pattern.permute.xlu0 %v768_v12 }
  0x20   :  { %702 = vmatmul.msk.bf16.vlgmr.msra.gmra.mxu0 %vm358_vm0, %v1002_v38  ;;  %703 = vmatmul.msk.bf16.vlgmr.msra.gmra.mxu1 %vm358_vm0, %v1002_v38  ;;  %v732_v6 = vld [vmem:[%s1173_s0 + $0xac] sm:$0xf0]  ;;  %v562_v9 = vld [vmem:[%s1173_s0 + $0xb0] sm:$0xf0]  ;;  %v733_v11 = vld [vmem:[%s1173_s0 + $0xb4] sm:$0xf0] }
  0x21   :  { %415 = vmatpush.bf16.msrb.mxu0 %v689_v28  ;;  %428 = vmatpush.bf16.msrb.mxu1 %v693_v29  ;;  %v729_v13 = vld [vmem:[%s1173_s0 + $0x9c] sm:$0xf]  ;;  %v561_v15 = vor.u32 %v732_v6, %v560_v5  ;;  %v565_v16 = vor.u32 %v728_v7, %v562_v9  ;;  %v569_v17 = vor.u32 %v733_v11, %v568_v10  ;;  %v528_v18 = vld [vmem:[%s1173_s0 + $0x50] sm:$0xf]  ;;  %v720_v20 = vld [vmem:[%s1173_s0 + $0x54] sm:$0xf] }
  0x22   :  { %441 = vmatpush.bf16.msrb.mxu2 %v697_v30  ;;  %705 = vmatmul.msk.bf16.vlgmr.msra.gmra.mxu3 %vm358_vm0, %v1002_v38  ;;  %v570_v14 = vld [vmem:[%s1173_s0 + $0xb8] sm:$0xf0]  ;;  %v724_v19 = vld [vmem:[%s1173_s0 + $0x6c] sm:$0xf0]  ;;  %v530_v22 = vld [vmem:[%s1173_s0 + $0x70] sm:$0xf0] }
  0x23   :  { %454 = vmatpush.bf16.msrb.mxu3 %v701_v34  ;;  %704 = vmatmul.msk.bf16.vlgmr.msra.gmra.mxu2 %vm358_vm0, %v1002_v38  ;;  %v573_v21 = vor.u32 %v729_v13, %v570_v14  ;;  %v536_v23 = vld [vmem:[%s1173_s0 + $0x58] sm:$0xf]  ;;  %v721_v25 = vld [vmem:[%s1173_s0 + $0x5c] sm:$0xf]  ;;  %v529_v27 = vor.u32 %v724_v19, %v528_v18  ;;  %v533_v28 = vor.u32 %v720_v20, %v530_v22  ;;  %v496_v30 = vld [vmem:[%s1173_s0 + $0x10] sm:$0xf] }
  0x24   :  { %75 = vperm.xlu0 %767, %v72_v2   ;;  %v725_v24 = vld [vmem:[%s1173_s0 + $0x74] sm:$0xf0]  ;;  %v538_v26 = vld [vmem:[%s1173_s0 + $0x78] sm:$0xf0]  ;;  %v716_v31 = vld [vmem:[%s1173_s0 + $0x2c] sm:$0xf0] }
  0x25   :  { %416 = vmatpush.bf16.msrb.mxu0 %v657_v41  ;;  %429 = vmatpush.bf16.msrb.mxu1 %v661_v42  ;;  %v537_v29 = vor.u32 %v725_v24, %v536_v23  ;;  %v712_v32 = vld [vmem:[%s1173_s0 + $0x14] sm:$0xf]  ;;  %v541_v33 = vor.u32 %v721_v25, %v538_v26  ;;  %v504_v35 = vld [vmem:[%s1173_s0 + $0x18] sm:$0xf]  ;;  %v713_v37 = vld [vmem:[%s1173_s0 + $0x1c] sm:$0xf]  ;;  %v497_v40 = vor.u32 %v716_v31, %v496_v30 }
  0x26   :  { %442 = vmatpush.bf16.msrb.mxu2 %v665_v43  ;;  %v498_v34 = vld [vmem:[%s1173_s0 + $0x30] sm:$0xf0]  ;;  %v717_v36 = vld [vmem:[%s1173_s0 + $0x34] sm:$0xf0]  ;;  %v506_v39 = vld [vmem:[%s1173_s0 + $0x38] sm:$0xf0] }
  0x27   :  { %455 = vmatpush.bf16.msrb.mxu3 %v669_v47  ;;  %v501_v41 = vor.u32 %v712_v32, %v498_v34  ;;  %v505_v42 = vor.u32 %v717_v36, %v504_v35  ;;  %v509_v43 = vor.u32 %v713_v37, %v506_v39 }
  0x29   :  { %417 = vmatpush.bf16.msrb.mxu0 %v625_v53  ;;  %430 = vmatpush.bf16.msrb.mxu1 %v629_v54 }
  0x2a   :  { %443 = vmatpush.bf16.msrb.mxu2 %v633_v55 }
  0x2b   :  { %456 = vmatpush.bf16.msrb.mxu3 %v637_v59 }
  0x2d   :  { %418 = vmatpush.bf16.msrb.mxu0 %v593_v1  ;;  %431 = vmatpush.bf16.msrb.mxu1 %v597_v3 }
  0x2e   :  { %444 = vmatpush.bf16.msrb.mxu2 %v601_v4 }
  0x2f   :  { %457 = vmatpush.bf16.msrb.mxu3 %v605_v8 }
  0x31   :  { %419 = vmatpush.bf16.msrb.mxu0 %v561_v15  ;;  %432 = vmatpush.bf16.msrb.mxu1 %v565_v16 }
  0x32   :  { %445 = vmatpush.bf16.msrb.mxu2 %v569_v17 }
  0x33   :  { %458 = vmatpush.bf16.msrb.mxu3 %v573_v21 }
  0x35   :  { %420 = vmatpush.bf16.msrb.mxu0 %v529_v27  ;;  %433 = vmatpush.bf16.msrb.mxu1 %v533_v28 }
  0x36   :  { %446 = vmatpush.bf16.msrb.mxu2 %v537_v29 }
  0x37   :  { %459 = vmatpush.bf16.msrb.mxu3 %v541_v33 }
  0x39   :  { %421 = vmatpush.bf16.msrb.mxu0 %v497_v40  ;;  %434 = vmatpush.bf16.msrb.mxu1 %v501_v41 }
  0x3a   :  { %447 = vmatpush.bf16.msrb.mxu2 %v505_v42 }
  0x3b   :  { %460 = vmatpush.bf16.msrb.mxu3 %v509_v43 }
  0x3c   :  { %706 = vmatmul.msk.bf16.vlgmr.msrb.gmra.mxu0 %vm358_vm0, %v1002_v38  ;;  %707 = vmatmul.msk.bf16.vlgmr.msrb.gmra.mxu1 %vm358_vm0, %v1002_v38 }
  0x3d   :  { %708 = vmatmul.msk.bf16.vlgmr.msrb.gmra.mxu2 %vm358_vm0, %v1002_v38 }
  0x3e   :  { %709 = vmatmul.msk.bf16.vlgmr.msrb.gmra.mxu3 %vm358_vm0, %v1002_v38 }
  0x96   :  { %v76_v44 = vpop.permute.xlu0 %75 }
  0x9d   :  { %v371_v45 = vpop.f32.mrf.mxu0  ;;  %v384_v46 = vpop.f32.mrf.mxu1 }
  0x9e   :  { %v372_v47 = vadd.f32 %v371_v45, %v76_v44  ;;  %v385_v48 = vadd.f32 %v384_v46, %v76_v44 }
  0xa0   :  { %466 = vst [vmem:[%s1176_s3] sm:$0xff] %v372_v47 }
  0xa1   :  { %467 = vst [vmem:[%s1176_s3 + $0x8] sm:$0xff] %v385_v48 }
  0xa5   :  { %v410_v50 = vpop.f32.mrf.mxu3  ;;  %v373_v38 = vpop.f32.mrf.mxu0 }
  0xa6   :  { %v397_v49 = vpop.f32.mrf.mxu2  ;;  %v411_v52 = vadd.f32 %v410_v50, %v76_v44  ;;  %v386_v53 = vpop.f32.mrf.mxu1 }
  0xa7   :  { %v398_v51 = vadd.f32 %v397_v49, %v76_v44 }
  0xa8   :  { %469 = vst [vmem:[%s1176_s3 + $0x18] sm:$0xff] %v411_v52 }
  0xa9   :  { %468 = vst [vmem:[%s1176_s3 + $0x10] sm:$0xff] %v398_v51 }
  0xad   :  { %v412_v55 = vpop.f32.mrf.mxu3 }
  0xae   :  { %v399_v54 = vpop.f32.mrf.mxu2 }
  0xb9   :  { %v423_v56 = vpop.f32.mrf.mxu0  ;;  %v436_v58 = vpop.f32.mrf.mxu1 }
  0xba   :  { %v424_v57 = vadd.f32 %v423_v56, %v76_v44  ;;  %v437_v59 = vadd.f32 %v436_v58, %v76_v44 }
  0xbc   :  { %470 = vst [vmem:[%s1176_s3 + $0x20] sm:$0xff] %v424_v57 }
  0xbd   :  { %471 = vst [vmem:[%s1176_s3 + $0x28] sm:$0xff] %v437_v59 }
  0xc0   :  { %v449_v60 = vpop.f32.mrf.mxu2 }
  0xc1   :  { %v450_v61 = vadd.f32 %v449_v60, %v76_v44  ;;  %v462_v62 = vpop.f32.mrf.mxu3  ;;  %v425_v63 = vpop.f32.mrf.mxu0 }
  0xc2   :  { %v463_v0 = vadd.f32 %v462_v62, %v76_v44  ;;  %v438_v1 = vpop.f32.mrf.mxu1 }
  0xc3   :  { %472 = vst [vmem:[%s1176_s3 + $0x30] sm:$0xff] %v450_v61 }
  0xc4   :  { %473 = vst [vmem:[%s1176_s3 + $0x38] sm:$0xff] %v463_v0 }
  0xc8   :  { %v451_v2 = vpop.f32.mrf.mxu2 }
  0xc9   :  { %v464_v3 = vpop.f32.mrf.mxu3 }

</bundles_post_ra>
